<compile_context>
chip_gen: v7x
topology: tpu7x:2x2x1
jax: 0.10.0
libtpu: 0.0.40
codegen_flags: <defaults>
</compile_context>

<pallas_src>
import math
import jax
import jax.numpy as jnp
from jax.experimental import pallas as pl
from jax.experimental.pallas import tpu as pltpu


def create_sin_cos_encoding(embedding: int, n: int) -> jax.Array:
    """Standard transformer sin/cos positional encoding table (n, embedding)."""
    pos = jnp.arange(n, dtype=jnp.float32)[:, None]                     # (n,1)
    i = jnp.arange(0, embedding, 2, dtype=jnp.float32)                  # (E/2,)
    div = jnp.exp(-math.log(10000.0) * i / embedding)                   # (E/2,)
    ang = pos * div[None, :]                                            # (n,E/2)
    pe = jnp.zeros((n, embedding), jnp.float32)
    pe = pe.at[:, 0::2].set(jnp.sin(ang))
    pe = pe.at[:, 1::2].set(jnp.cos(ang))
    return pe


# ----------------------------------------------------------------------------
# Single fused Pallas kernel:
#   out = silu( Wt @ patches + bias )
#     Wt      : (Cout, K)      bf16   3x3 conv weight, K = Cin*9
#     patches : (K, B*HW)      bf16   im2col of the padded input
#     bias    : (Cout, B*HW)   f32    spatial + conv + per-sample conditioning
#     out     : (Cout, B*HW)   f32    single lane-dense store
# ----------------------------------------------------------------------------
def _fused_kernel(patches_ref, wt_ref, bias_ref, out_ref):
    acc = jnp.dot(wt_ref[...], patches_ref[...],
                  preferred_element_type=jnp.float32)          # (Cout, B*HW)
    acc = acc + bias_ref[...]
    out_ref[...] = (acc * jax.nn.sigmoid(acc)).astype(out_ref.dtype)


def fused_forward(patches, wt, bias):
    K, BHW = patches.shape
    Cout = wt.shape[0]

    def full(shape):
        return pl.BlockSpec(shape, lambda i: (0,) * len(shape))

    return pl.pallas_call(
        _fused_kernel,
        out_shape=jax.ShapeDtypeStruct((Cout, BHW), jnp.float32),
        grid=(1,),
        in_specs=[
            full(patches.shape),     # (K, B*HW)
            full(wt.shape),          # (Cout, K)
            full(bias.shape),        # (Cout, B*HW)
        ],
        out_specs=full((Cout, BHW)),
        compiler_params=pltpu.CompilerParams(
            dimension_semantics=("arbitrary",)),
    )(patches, wt, bias)


@jax.jit
def model_forward(params, X, t, c):
    B, Cin, H, W = X.shape
    Cout, HW = params["sbias"].shape

    # im2col emitted directly in the final (K, B*HW) layout so XLA fuses the
    # pad + slice + transpose into one copy (no extra stack/reshape pass).
    # K ordering (cin, kh, kw) matches the OIHW weight reshape.
    x_pad = jnp.pad(X, ((0, 0), (0, 0), (1, 1), (1, 1)))
    cols = [x_pad[:, :, kh:kh + H, kw:kw + W]
            for kh in range(3) for kw in range(3)]               # 9x (B,Cin,H,W)
    patches = jnp.stack(cols, axis=2)                            # (B,Cin,9,H,W)
    patches = jnp.transpose(patches, (1, 2, 0, 3, 4)).reshape(
        Cin * 9, B * H * W)                                      # (K, B*HW)

    # Constant-folded conditioning: tiny (B, Cout) gather-add in the wrapper.
    t = jnp.clip(t.astype(jnp.int32), 0, params["pre_t"].shape[0] - 1)
    c = jnp.clip(c.astype(jnp.int32), 0, params["pre_c"].shape[0] - 1)
    cond = params["pre_t"][t] + params["pre_c"][c]               # (B, Cout)

    # Full fused bias (spatial + conv bias + conditioning), lane-dense.
    bias = (params["sbias"][:, None, :]
            + cond.T[:, :, None]).reshape(Cout, B * HW)          # (Cout, B*HW)

    # bf16 matmul inputs (DMA + MXU rate); accumulation / elementwise in f32.
    out = fused_forward(patches.astype(jnp.bfloat16),
                        params["wt"].astype(jnp.bfloat16),
                        bias)                                    # (Cout, B*HW)

    # NCHW restore: cheap wrapper reshape/transpose outside the kernel.
    return out.reshape(Cout, B, H, W).transpose(1, 0, 2, 3)      # (B,Cout,H,W)


class PallasModel:
    def __init__(self, in_ch=3, out_ch=3, w_size=16, h_size=16,
                 steps=64, categories=5, embedding=64, key=None):
        if key is None:
            key = jax.random.PRNGKey(0)
        k_cat, k_w1, k_b1, k_pt, k_pc, k_ps = jax.random.split(key, 6)

        self.out_ch = out_ch

        # Embedding tables (as in the reference Model).
        w_weight = create_sin_cos_encoding(embedding, w_size)
        h_weight = create_sin_cos_encoding(embedding, h_size)
        step_table = create_sin_cos_encoding(embedding, steps)
        # nn.Embedding default init ~ N(0, 1)
        category_table = jax.random.normal(k_cat, (categories, embedding),
                                           jnp.float32)

        # TODO(synk): UNet class is not defined in the reference snippet; a
        # conditioned 3x3 conv + SiLU block is used as a deterministic
        # stand-in for unet(X, t, s, c).
        fan_in = in_ch * 9
        w1 = jax.random.normal(k_w1, (out_ch, in_ch, 3, 3),
                               jnp.float32) / math.sqrt(fan_in)     # OIHW
        b1 = jax.random.normal(k_b1, (out_ch,), jnp.float32) * 0.01
        pt = jax.random.normal(k_pt, (embedding, out_ch),
                               jnp.float32) / math.sqrt(embedding)
        pc = jax.random.normal(k_pc, (embedding, out_ch),
                               jnp.float32) / math.sqrt(embedding)
        ps = jax.random.normal(k_ps, (embedding, out_ch),
                               jnp.float32) / math.sqrt(embedding)

        # Static precompute 1: spatial embeddings are indexed with constant
        # aranges, so spatial bias + conv bias collapses to one (Cout, HW)
        # compile-time tensor (hw ordering = h*W + w).
        sw_proj = w_weight @ ps                                    # (W, Cout)
        sh_proj = h_weight @ ps                                    # (H, Cout)
        spatial = (sw_proj[None, :, :] + sh_proj[:, None, :]
                   + b1[None, None, :])                            # (H, W, Cout)
        sbias = jnp.transpose(spatial, (2, 0, 1)).reshape(
            out_ch, h_size * w_size)                               # (Cout, HW)

        # Static precompute 2: fold the step / category embedding tables
        # through their projections -> small per-index bias tables.
        pre_t = step_table @ pt                                    # (steps, Cout)
        pre_c = category_table @ pc                                # (cat,   Cout)

        self.params = {
            "wt": w1.reshape(out_ch, in_ch * 9),                   # (Cout, K)
            "sbias": sbias,                                        # (Cout, HW)
            "pre_t": pre_t,                                        # (steps, Cout)
            "pre_c": pre_c,                                        # (cat,   Cout)
        }

    def __call__(self, X, t, c):
        # X: (B, C, H, W) float32   t: (B,) int32   c: (B,) int32
        return model_forward(self.params, X, t, c)


if __name__ == "__main__":
    key = jax.random.PRNGKey(0)
    k_x, k_t, k_c, k_p = jax.random.split(key, 4)

    B, C, H, W = 2, 3, 16, 16
    steps, categories, embedding = 64, 5, 64

    model = PallasModel(in_ch=C, out_ch=C, w_size=W, h_size=H,
                        steps=steps, categories=categories,
                        embedding=embedding, key=k_p)

    X = jax.random.normal(k_x, (B, C, H, W), jnp.float32)
    t = jax.random.randint(k_t, (B,), 0, steps, jnp.int32)
    c = jax.random.randint(k_c, (B,), 0, categories, jnp.int32)

    out = model(X, t, c)
    out = jax.block_until_ready(out)
    assert out.shape == (B, C, H, W), out.shape
    assert jnp.all(jnp.isfinite(out))
    print("KERNEL_OK")
</pallas_src>

<mosaic_0001>
module attributes {stable_mosaic.version = 11 : i64} {
  func.func @_fused_kernel(%arg0: i32, %arg1: memref<27x512xbf16, #tpu.memory_space<vmem>>, %arg2: memref<3x27xbf16, #tpu.memory_space<vmem>>, %arg3: memref<3x512xf32, #tpu.memory_space<vmem>>, %arg4: memref<3x512xf32, #tpu.memory_space<vmem>>) attributes {dimension_semantics = [#tpu.dimension_semantics<arbitrary>], iteration_bounds = array<i64: 1>, scalar_prefetch = 0 : i64, scratch_operands = 0 : i64, tpu.core_type = #tpu.core_type<tc>, window_params = [{pipeline_mode = #tpu.pipeline_mode<synchronous>, transform_indices = @transform_0, window_bounds = array<i64: 27, 512>}, {pipeline_mode = #tpu.pipeline_mode<synchronous>, transform_indices = @transform_1, window_bounds = array<i64: 3, 27>}, {pipeline_mode = #tpu.pipeline_mode<synchronous>, transform_indices = @transform_2, window_bounds = array<i64: 3, 512>}, {pipeline_mode = #tpu.pipeline_mode<synchronous>, transform_indices = @transform_3, window_bounds = array<i64: 3, 512>}]} {
    %c0 = arith.constant 0 : index
    %c0_0 = arith.constant 0 : index
    %0 = vector.load %arg2[%c0, %c0_0] : memref<3x27xbf16, #tpu.memory_space<vmem>>, vector<3x27xbf16>
    %c0_1 = arith.constant 0 : index
    %c0_2 = arith.constant 0 : index
    %1 = vector.load %arg1[%c0_1, %c0_2] : memref<27x512xbf16, #tpu.memory_space<vmem>>, vector<27x512xbf16>
    %cst = arith.constant dense<0.000000e+00> : vector<3x512xf32>
    %2 = tpu.matmul %0, %1, %cst {dimension_numbers = #tpu.dot_dimension_numbers<[1], [0], [0], [1], [0, 0, 1, 1], [], []>} : vector<3x27xbf16>, vector<27x512xbf16>, vector<3x512xf32> -> vector<3x512xf32>
    %c0_3 = arith.constant 0 : index
    %c0_4 = arith.constant 0 : index
    %3 = vector.load %arg3[%c0_3, %c0_4] : memref<3x512xf32, #tpu.memory_space<vmem>>, vector<3x512xf32>
    %4 = arith.addf %2, %3 : vector<3x512xf32>
    %5 = arith.negf %4 : vector<3x512xf32>
    %6 = math.exp %5 : vector<3x512xf32>
    %cst_5 = arith.constant 1.000000e+00 : f32
    %7 = vector.broadcast %cst_5 : f32 to vector<3x512xf32>
    %8 = arith.addf %7, %6 : vector<3x512xf32>
    %9 = arith.divf %7, %8 : vector<3x512xf32>
    %10 = arith.mulf %4, %9 : vector<3x512xf32>
    %c0_6 = arith.constant 0 : index
    %c0_7 = arith.constant 0 : index
    %11 = vector.load %arg4[%c0_6, %c0_7] : memref<3x512xf32, #tpu.memory_space<vmem>>, vector<3x512xf32>
    tpu.vector_store %arg4[%c0_6, %c0_7], %10 {strides = array<i32>} : memref<3x512xf32, #tpu.memory_space<vmem>>, vector<3x512xf32>,
    return
  }
  func.func @transform_0(%arg0: i32) -> (i32, i32) {
    %c0_i32 = arith.constant 0 : i32
    %c0_i32_0 = arith.constant 0 : i32
    %c0_i32_1 = arith.constant 0 : i32
    return %c0_i32, %c0_i32_0 : i32, i32
  }
  func.func @transform_1(%arg0: i32) -> (i32, i32) {
    %c0_i32 = arith.constant 0 : i32
    %c0_i32_0 = arith.constant 0 : i32
    %c0_i32_1 = arith.constant 0 : i32
    return %c0_i32, %c0_i32_0 : i32, i32
  }
  func.func @transform_2(%arg0: i32) -> (i32, i32) {
    %c0_i32 = arith.constant 0 : i32
    %c0_i32_0 = arith.constant 0 : i32
    %c0_i32_1 = arith.constant 0 : i32
    return %c0_i32, %c0_i32_0 : i32, i32
  }
  func.func @transform_3(%arg0: i32) -> (i32, i32) {
    %c0_i32 = arith.constant 0 : i32
    %c0_i32_0 = arith.constant 0 : i32
    %c0_i32_1 = arith.constant 0 : i32
    return %c0_i32, %c0_i32_0 : i32, i32
  }
}

</mosaic_0001>

<bundles_post_ra>
// kernel: model_forward.1
= control target key start
LH: loop header
LB: loop body
LE: loop exit
PB: predicated region body
PF: predicated region fallthrough
CT: control target
= control target key end

     0   :  { %vm72_vm0 = vcmask 1044480   ;;  %vm73_vm1 = vcmask 1045504   ;;  %v258_v1 = vmov 65535   ;;  %v259_v3 = vmov 0   ;;  %s319_s0 = inlined_call_operand.vmem [shape: bf16[27,512], index: 0, kind: input, shape index: {}]   ;;  %s320_s1 = inlined_call_operand.vmem [shape: bf16[3,27], index: 1, kind: input, shape index: {}]   ;;  %s321_s2 = inlined_call_operand.vmem [shape: f32[3,512], index: 2, kind: input, shape index: {}]   ;;  %s322_s3 = inlined_call_operand.vmem [shape: f32[3,512], index: 3, kind: output, shape index: {}]  }
   0x1   :  { %v228_v0 = vld [vmem:[%s319_s0 + $0x4] ss:$16 sps:$4 sm:$0xff]   ;;  %v74_v2 = vsel %vm72_vm0, 4294967295, %v258_v1  ;;  %120 = vmatprep.mubr.bf16.mxu0 %v259_v3  ;;  %161 = vmatprep.mubr.bf16.mxu1 %v259_v3  ;;  %v230_v4 = vld [vmem:[%s319_s0 + $0xc] ss:$16 sps:$4 sm:$0xff]   ;;  %vm68_vm2 = vcmask 220160  }
   0x2   :  { %88 = vmatprep.subr.bf16.mxu0 %v228_v0  ;;  %v232_v5 = vld [vmem:[%s319_s0] ss:$16 sps:$4 sm:$0xff]   ;;  %v233_v6 = vld [vmem:[%s319_s0 + $0x8] ss:$16 sps:$4 sm:$0xff]   ;;  %v75_v7 = vsel %vm73_vm1, %v74_v2, 0  ;;  %129 = vmatprep.subr.bf16.mxu1 %v230_v4 }
   0x3   :  { %v234_v8 = vld [vmem:[%s319_s0 + $0x24] ss:$16 sps:$4 sm:$0x3f]   ;;  %89 = vmatpush1.bf16.msra.mxu0 %v232_v5  ;;  %130 = vmatpush1.bf16.msra.mxu1 %v233_v6  ;;  %v236_v9 = vld [vmem:[%s319_s0 + $0x2c] ss:$16 sps:$4 sm:$0x3f]  }
   0x4   :  { %v80_v10 = vand.u32 %v234_v8, %v75_v7  ;;  %v238_v11 = vld [vmem:[%s319_s0 + $0x20] ss:$16 sps:$4 sm:$0x3f]   ;;  %v239_v12 = vld [vmem:[%s319_s0 + $0x28] ss:$16 sps:$4 sm:$0x3f]   ;;  %v86_v13 = vand.u32 %v236_v9, %v75_v7 }
   0x5   :  { %v77_v14 = vand.u32 %v238_v11, %v75_v7  ;;  %v83_v15 = vand.u32 %v239_v12, %v75_v7  ;;  %v15_v16 = vld [vmem:[%s320_s1] sm:$0x3]  ;;  %v25_v18 = vld [vmem:[%s321_s2 + $0x8] sm:$0x77] }
   0x6   :  { %90 = vmatprep.subr.bf16.mxu0 %v80_v10  ;;  %131 = vmatprep.subr.bf16.mxu1 %v86_v13  ;;  %v24_v17 = vld [vmem:[%s321_s2] sm:$0x77]  ;;  %v65_v20 = vcombine.high %v25_v18, %v25_v18 }
   0x7   :  { %91 = vmatpush1.bf16.msra.mxu0 %v77_v14  ;;  %132 = vmatpush1.bf16.msra.mxu1 %v83_v15  ;;  %v64_v19 = vcombine.high %v24_v17, %v24_v17 }
   0xa   :  { %220 = vmatmul.mubr.msk.bf16.vlgmr.msra.gmra.mrb[0].mxu0 %vm68_vm2, %v15_v16  ;;  %221 = vmatmul.mubr.msk.bf16.vlgmr.msra.gmra.mrb[0].mxu1 %vm68_vm2, %v15_v16 }
  0xdd   :  { %v122_v21 = vpop.f32.mrb[0].mxu0  ;;  %v163_v22 = vpop.f32.mrb[0].mxu1 }
  0xde   :  { %v123_v23 = vadd.f32 %v122_v21, %v24_v17  ;;  %v164_v24 = vadd.f32 %v163_v22, %v25_v18  ;;  %v124_v25 = vpop.f32.mrb[1].mxu0  ;;  %v165_v26 = vpop.f32.mrb[1].mxu1 }
  0xdf   :  { %v125_v27 = vadd.f32 %v124_v25, %v64_v19  ;;  %v166_v28 = vadd.f32 %v165_v26, %v65_v20  ;;  %v126_v29 = vpop.f32.mrb[2].mxu0  ;;  %v167_v30 = vpop.f32.mrb[2].mxu1 }
  0xe0   :  { %v222_v31 = vmul.f32 -1.442695, %v123_v23  ;;  %v224_v32 = vmul.f32 -1.442695, %v164_v24  ;;  %v127_v33 = vpop.f32.mrb[3].mxu0  ;;  %v168_v34 = vpop.f32.mrb[3].mxu1 }
  0xe1   :  { %v223_v35 = vmul.f32 -1.442695, %v125_v27  ;;  %v225_v36 = vmul.f32 -1.442695, %v166_v28 }
  0xe2   :  { %242 = vpow2.f32 %v222_v31 }
  0xe3   :  { %244 = vpow2.f32 %v224_v32 }
  0xe4   :  { %246 = vpow2.f32 %v223_v35 }
  0xe5   :  { %248 = vpow2.f32 %v225_v36 }
  0xec   :  { %v243_v37 = vpop.eup %242 }
  0xed   :  { %v245_v38 = vpop.eup %244  ;;  %v182_v39 = vadd.f32 1.0, %v243_v37 }
  0xee   :  { %v247_v40 = vpop.eup %246  ;;  %v184_v41 = vadd.f32 1.0, %v245_v38 }
  0xef   :  { %v249_v42 = vpop.eup %248  ;;  %250 = vrcp.f32 %v182_v39  ;;  %v183_v43 = vadd.f32 1.0, %v247_v40 }
  0xf0   :  { %252 = vrcp.f32 %v184_v41  ;;  %v185_v44 = vadd.f32 1.0, %v249_v42 }
  0xf1   :  { %254 = vrcp.f32 %v183_v43 }
  0xf2   :  { %256 = vrcp.f32 %v185_v44 }
  0xf9   :  { %v251_v45 = vpop.eup %250 }
  0xfa   :  { %v253_v46 = vpop.eup %252  ;;  %v194_v47 = vmul.f32 %v251_v45, %v123_v23 }
  0xfb   :  { %v255_v48 = vpop.eup %254  ;;  %v196_v49 = vmul.f32 %v253_v46, %v164_v24 }
  0xfc   :  { %v257_v50 = vpop.eup %256  ;;  %v195_v51 = vmul.f32 %v255_v48, %v125_v27 }
  0xfd   :  { %v197_v52 = vmul.f32 %v257_v50, %v166_v28 }
  0xfe   :  { %v202_v53 = vcombine.low %v194_v47, %v195_v51 }
  0xff   :  { %v203_v54 = vcombine.low %v196_v49, %v197_v52 }
 0x100   :  { %206 = vst [vmem:[%s322_s3] sm:$0x77] %v202_v53 }
 0x101   :  { %207 = vst [vmem:[%s322_s3 + $0x8] sm:$0x77] %v203_v54 }

</bundles_post_ra>
